<compile_context>
chip_gen: v6e
topology: v6e:2x2x1
jax: 0.10.0
libtpu: 0.0.40
codegen_flags: <defaults>
</compile_context>

<pallas_src>
import jax
import jax.numpy as jnp
from jax.experimental import pallas as pl
from jax.experimental.pallas import tpu as pltpu

INPUT_LENGHT = 14
OUTPUT_LENGHT = INPUT_LENGHT
HIDDEN = 50


def _round_up(n, m):
    return ((n + m - 1) // m) * m


def mlp_kernel(x_ref, w1_ref, b1_ref, w2_ref, b2_ref, w3_ref, b3_ref, o_ref):
    # (features, batch) orientation: last (lane) axis is the batch tile (TB, mult of 128).
    x = x_ref[...]                                                        # (14, TB)
    h1 = jnp.dot(w1_ref[...], x, preferred_element_type=jnp.float32)     # (50, TB)
    h1 = jnp.maximum(h1 + b1_ref[...], 0.0)
    h2 = jnp.dot(w2_ref[...], h1, preferred_element_type=jnp.float32)    # (50, TB)
    h2 = jnp.maximum(h2 + b2_ref[...], 0.0)
    y = jnp.dot(w3_ref[...], h2, preferred_element_type=jnp.float32)     # (14, TB)
    o_ref[...] = (y + b3_ref[...]).astype(o_ref.dtype)


def mlp_forward(x, params, *, tb=512):
    """x: (B, INPUT_LENGHT) f32. params in torch-native layout:
    w: (out, in), b: (out,).  Returns (B, OUTPUT_LENGHT) f32."""
    (w1, b1, w2, b2, w3, b3) = params
    B = x.shape[0]

    # Batch tile: multiple of 128 lanes, no larger than needed for small batches.
    tb = max(128, (tb // 128) * 128)
    tb = min(tb, _round_up(B, 128))
    B_pad = _round_up(B, tb)
    grid = (B_pad // tb,)

    # Flip to (features, batch) so batch lives on the lane axis; pad batch.
    x_t = jnp.pad(x.T, ((0, 0), (0, B_pad - B)))                          # (14, B_pad)

    # Biases as (out, 1) columns so they broadcast over the batch lanes.
    b1c, b2c, b3c = b1.reshape(-1, 1), b2.reshape(-1, 1), b3.reshape(-1, 1)

    # Grid-invariant operands: full-array blocks, constant index_map -> fetched once.
    def resident(a):
        return pl.BlockSpec(a.shape, lambda i: (0, 0))

    flops = 2 * B_pad * (INPUT_LENGHT * HIDDEN + HIDDEN * HIDDEN + HIDDEN * OUTPUT_LENGHT)
    weight_bytes = 4 * (w1.size + w2.size + w3.size + b1.size + b2.size + b3.size)
    bytes_accessed = 4 * B_pad * (INPUT_LENGHT + OUTPUT_LENGHT) + weight_bytes

    out_t = pl.pallas_call(
        mlp_kernel,
        out_shape=jax.ShapeDtypeStruct((OUTPUT_LENGHT, B_pad), jnp.float32),
        grid=grid,
        in_specs=[
            pl.BlockSpec((INPUT_LENGHT, tb), lambda i: (0, i)),
            resident(w1), resident(b1c),
            resident(w2), resident(b2c),
            resident(w3), resident(b3c),
        ],
        out_specs=pl.BlockSpec((OUTPUT_LENGHT, tb), lambda i: (0, i)),
        compiler_params=pltpu.CompilerParams(
            dimension_semantics=("parallel",),
        ),
        cost_estimate=pl.CostEstimate(
            flops=int(flops), transcendentals=0, bytes_accessed=int(bytes_accessed)),
    )(x_t, w1, b1c, w2, b2c, w3, b3c)

    # Back to the torch-facing (batch, features) layout; drop batch padding.
    return out_t[:, :B].T


def init_params(key):
    """Deterministic init mimicking torch.nn.Linear defaults (uniform +/- 1/sqrt(fan_in)).
    Weights kept in torch-native (out, in) layout; biases as (out,)."""
    def linear(key, fan_in, fan_out):
        kw, kb = jax.random.split(key)
        bound = 1.0 / jnp.sqrt(fan_in)
        w = jax.random.uniform(kw, (fan_out, fan_in), jnp.float32, -bound, bound)
        b = jax.random.uniform(kb, (fan_out,), jnp.float32, -bound, bound)
        return w, b

    k1, k2, k3 = jax.random.split(key, 3)
    w1, b1 = linear(k1, INPUT_LENGHT, HIDDEN)
    w2, b2 = linear(k2, HIDDEN, HIDDEN)
    w3, b3 = linear(k3, HIDDEN, OUTPUT_LENGHT)
    return (w1, b1, w2, b2, w3, b3)


def reference_forward(x, params):
    (w1, b1, w2, b2, w3, b3) = params
    h = jnp.maximum(x @ w1.T + b1, 0.0)
    h = jnp.maximum(h @ w2.T + b2, 0.0)
    return h @ w3.T + b3


if __name__ == "__main__":
    key = jax.random.PRNGKey(0)
    kx, kp = jax.random.split(key)
    batch = 8
    x = jax.random.normal(kx, (batch, INPUT_LENGHT), jnp.float32)
    params = init_params(kp)

    out = mlp_forward(x, params)
    out = jax.block_until_ready(out)

    ref = reference_forward(x, params)
    assert out.shape == (batch, OUTPUT_LENGHT)
    assert jnp.allclose(out, ref, atol=1e-5, rtol=1e-5)
    print("KERNEL_OK")
</pallas_src>

<mosaic_0001>
module attributes {stable_mosaic.version = 11 : i64} {
  func.func @mlp_kernel(%arg0: i32, %arg1: memref<14x128xf32, #tpu.memory_space<vmem>>, %arg2: memref<50x14xf32, #tpu.memory_space<vmem>>, %arg3: memref<50x1xf32, #tpu.memory_space<vmem>>, %arg4: memref<50x50xf32, #tpu.memory_space<vmem>>, %arg5: memref<50x1xf32, #tpu.memory_space<vmem>>, %arg6: memref<14x50xf32, #tpu.memory_space<vmem>>, %arg7: memref<14x1xf32, #tpu.memory_space<vmem>>, %arg8: memref<14x128xf32, #tpu.memory_space<vmem>>) attributes {dimension_semantics = [#tpu.dimension_semantics<parallel>], iteration_bounds = array<i64: 1>, scalar_prefetch = 0 : i64, scratch_operands = 0 : i64, tpu.core_type = #tpu.core_type<tc>, window_params = [{transform_indices = @transform_0, window_bounds = array<i64: 14, 128>}, {pipeline_mode = #tpu.pipeline_mode<synchronous>, transform_indices = @transform_1, window_bounds = array<i64: 50, 14>}, {pipeline_mode = #tpu.pipeline_mode<synchronous>, transform_indices = @transform_2, window_bounds = array<i64: 50, 1>}, {pipeline_mode = #tpu.pipeline_mode<synchronous>, transform_indices = @transform_3, window_bounds = array<i64: 50, 50>}, {pipeline_mode = #tpu.pipeline_mode<synchronous>, transform_indices = @transform_4, window_bounds = array<i64: 50, 1>}, {pipeline_mode = #tpu.pipeline_mode<synchronous>, transform_indices = @transform_5, window_bounds = array<i64: 14, 50>}, {pipeline_mode = #tpu.pipeline_mode<synchronous>, transform_indices = @transform_6, window_bounds = array<i64: 14, 1>}, {transform_indices = @transform_7, window_bounds = array<i64: 14, 128>}]} {
    %c0 = arith.constant 0 : index
    %c0_0 = arith.constant 0 : index
    %0 = vector.load %arg1[%c0, %c0_0] : memref<14x128xf32, #tpu.memory_space<vmem>>, vector<14x128xf32>
    %c0_1 = arith.constant 0 : index
    %c0_2 = arith.constant 0 : index
    %1 = vector.load %arg2[%c0_1, %c0_2] : memref<50x14xf32, #tpu.memory_space<vmem>>, vector<50x14xf32>
    %cst = arith.constant dense<0.000000e+00> : vector<50x128xf32>
    %2 = tpu.matmul %1, %0, %cst {dimension_numbers = #tpu.dot_dimension_numbers<[1], [0], [0], [1], [0, 0, 1, 1], [], []>} : vector<50x14xf32>, vector<14x128xf32>, vector<50x128xf32> -> vector<50x128xf32>
    %c0_3 = arith.constant 0 : index
    %c0_4 = arith.constant 0 : index
    %3 = vector.load %arg3[%c0_3, %c0_4] : memref<50x1xf32, #tpu.memory_space<vmem>>, vector<50x1xf32>
    %4 = vector.broadcast %3 : vector<50x1xf32> to vector<50x128xf32>
    %5 = arith.addf %2, %4 : vector<50x128xf32>
    %cst_5 = arith.constant 0.000000e+00 : f32
    %6 = vector.broadcast %cst_5 : f32 to vector<50x128xf32>
    %7 = arith.maximumf %5, %6 : vector<50x128xf32>
    %c0_6 = arith.constant 0 : index
    %c0_7 = arith.constant 0 : index
    %8 = vector.load %arg4[%c0_6, %c0_7] : memref<50x50xf32, #tpu.memory_space<vmem>>, vector<50x50xf32>
    %cst_8 = arith.constant dense<0.000000e+00> : vector<50x128xf32>
    %9 = tpu.matmul %8, %7, %cst_8 {dimension_numbers = #tpu.dot_dimension_numbers<[1], [0], [0], [1], [0, 0, 1, 1], [], []>} : vector<50x50xf32>, vector<50x128xf32>, vector<50x128xf32> -> vector<50x128xf32>
    %c0_9 = arith.constant 0 : index
    %c0_10 = arith.constant 0 : index
    %10 = vector.load %arg5[%c0_9, %c0_10] : memref<50x1xf32, #tpu.memory_space<vmem>>, vector<50x1xf32>
    %11 = vector.broadcast %10 : vector<50x1xf32> to vector<50x128xf32>
    %12 = arith.addf %9, %11 : vector<50x128xf32>
    %cst_11 = arith.constant 0.000000e+00 : f32
    %13 = vector.broadcast %cst_11 : f32 to vector<50x128xf32>
    %14 = arith.maximumf %12, %13 : vector<50x128xf32>
    %c0_12 = arith.constant 0 : index
    %c0_13 = arith.constant 0 : index
    %15 = vector.load %arg6[%c0_12, %c0_13] : memref<14x50xf32, #tpu.memory_space<vmem>>, vector<14x50xf32>
    %cst_14 = arith.constant dense<0.000000e+00> : vector<14x128xf32>
    %16 = tpu.matmul %15, %14, %cst_14 {dimension_numbers = #tpu.dot_dimension_numbers<[1], [0], [0], [1], [0, 0, 1, 1], [], []>} : vector<14x50xf32>, vector<50x128xf32>, vector<14x128xf32> -> vector<14x128xf32>
    %c0_15 = arith.constant 0 : index
    %c0_16 = arith.constant 0 : index
    %17 = vector.load %arg7[%c0_15, %c0_16] : memref<14x1xf32, #tpu.memory_space<vmem>>, vector<14x1xf32>
    %18 = vector.broadcast %17 : vector<14x1xf32> to vector<14x128xf32>
    %19 = arith.addf %16, %18 : vector<14x128xf32>
    %c0_17 = arith.constant 0 : index
    %c0_18 = arith.constant 0 : index
    %20 = vector.load %arg8[%c0_17, %c0_18] : memref<14x128xf32, #tpu.memory_space<vmem>>, vector<14x128xf32>
    tpu.vector_store %arg8[%c0_17, %c0_18], %19 {strides = array<i32>} : memref<14x128xf32, #tpu.memory_space<vmem>>, vector<14x128xf32>,
    return
  }
  func.func @transform_0(%arg0: i32) -> (i32, i32) {
    %c0_i32 = arith.constant 0 : i32
    %c0_i32_0 = arith.constant 0 : i32
    return %c0_i32, %arg0 : i32, i32
  }
  func.func @transform_1(%arg0: i32) -> (i32, i32) {
    %c0_i32 = arith.constant 0 : i32
    %c0_i32_0 = arith.constant 0 : i32
    %c0_i32_1 = arith.constant 0 : i32
    return %c0_i32, %c0_i32_0 : i32, i32
  }
  func.func @transform_2(%arg0: i32) -> (i32, i32) {
    %c0_i32 = arith.constant 0 : i32
    %c0_i32_0 = arith.constant 0 : i32
    %c0_i32_1 = arith.constant 0 : i32
    return %c0_i32, %c0_i32_0 : i32, i32
  }
  func.func @transform_3(%arg0: i32) -> (i32, i32) {
    %c0_i32 = arith.constant 0 : i32
    %c0_i32_0 = arith.constant 0 : i32
    %c0_i32_1 = arith.constant 0 : i32
    return %c0_i32, %c0_i32_0 : i32, i32
  }
  func.func @transform_4(%arg0: i32) -> (i32, i32) {
    %c0_i32 = arith.constant 0 : i32
    %c0_i32_0 = arith.constant 0 : i32
    %c0_i32_1 = arith.constant 0 : i32
    return %c0_i32, %c0_i32_0 : i32, i32
  }
  func.func @transform_5(%arg0: i32) -> (i32, i32) {
    %c0_i32 = arith.constant 0 : i32
    %c0_i32_0 = arith.constant 0 : i32
    %c0_i32_1 = arith.constant 0 : i32
    return %c0_i32, %c0_i32_0 : i32, i32
  }
  func.func @transform_6(%arg0: i32) -> (i32, i32) {
    %c0_i32 = arith.constant 0 : i32
    %c0_i32_0 = arith.constant 0 : i32
    %c0_i32_1 = arith.constant 0 : i32
    return %c0_i32, %c0_i32_0 : i32, i32
  }
  func.func @transform_7(%arg0: i32) -> (i32, i32) {
    %c0_i32 = arith.constant 0 : i32
    %c0_i32_0 = arith.constant 0 : i32
    return %c0_i32, %arg0 : i32, i32
  }
}

</mosaic_0001>

<bundles_post_ra>
// kernel: tpu_custom_call.1
= control target key start
LH: loop header
LB: loop body
LE: loop exit
PB: predicated region body
PF: predicated region fallthrough
CT: control target
= control target key end

     0   :  { %vm100_vm0 = vcmask 1045504   ;;  %v667_v1 = vmov 0.0   ;;  %vm668_vm1 = vmmov 0   ;;  %vm78_vm2 = vcmask 113664   ;;  %s874_s0 = inlined_call_operand.vmem [shape: f32[14,128], index: 0, kind: input, shape index: {}]   ;;  %s875_s1 = inlined_call_operand.vmem [shape: f32[50,14], index: 1, kind: input, shape index: {}]   ;;  %s876_s2 = inlined_call_operand.vmem [shape: f32[50,1], index: 2, kind: input, shape index: {}]   ;;  %s877_s3 = inlined_call_operand.vmem [shape: f32[50,50], index: 3, kind: input, shape index: {}]   ;;  %s878_s4 = inlined_call_operand.vmem [shape: f32[50,1], index: 4, kind: input, shape index: {}]   ;;  %s879_s5 = inlined_call_operand.vmem [shape: f32[14,50], index: 5, kind: input, shape index: {}]   ;;  %s880_s6 = inlined_call_operand.vmem [shape: f32[14,1], index: 6, kind: input, shape index: {}]   ;;  %s881_s7 = inlined_call_operand.hbm [shape: f32[14,128], index: 7, kind: output, shape index: {}]  }
   0x1   :  { %v28_v0 = vld [vmem:[%s874_s0 + $0x8] sm:$0x3f]  ;;  %560 = vmatprep.subr.mxu0 %v667_v1  ;;  %v27_v2 = vld [vmem:[%s874_s0] sm:$0xff]  ;;  %564 = vmatprep.mubr.msk.f32.mxu0 %vm668_vm1, %v667_v1  ;;  %v669_v4 = vmov 0   ;;  %v42_v5 = vld [vmem:[%s876_s2 + $0x30] sm:$0x3] }
   0x2   :  { %561 = vmatpush3.msk.msra.mxu0 %vm100_vm0, %v28_v0  ;;  %v29_v3 = vld [vmem:[%s875_s1] sm:$0xff]  ;;  %643 = vset.pattern.permute.xlu0 %v669_v4  ;;  %v41_v7 = vld [vmem:[%s876_s2 + $0x28] sm:$0xff]  ;;  %v39_v9 = vld [vmem:[%s876_s2 + $0x18] sm:$0xff] }
   0x3   :  { %562 = vmatprep.subr.mxu0 %v667_v1  ;;  %644 = vset.pattern.permute.xlu1 %v669_v4  ;;  %v40_v6 = vld [vmem:[%s876_s2 + $0x20] sm:$0xff]  ;;  %v30_v8 = vld [vmem:[%s875_s1 + $0x8] sm:$0xff] }
   0x4   :  { %563 = vmatpush3.msra.mxu0 %v27_v2  ;;  %75 = vperm.xlu0 %643, %v42_v5  }
   0x5   :  { %565 = vmatmul.mubr.msk.f32.vlgmr.msra.gmra.mxu0 %vm78_vm2, %v29_v3  ;;  %65 = vperm.xlu1 %644, %v40_v6  }
   0x6   :  { %567 = vmatprep.mubr.msk.f32.mxu0 %vm668_vm1, %v667_v1  ;;  %585 = vmatprep.subr.mxu1 %v667_v1 }
   0x7   :  { %599 = vmatprep.mubr.msk.f32.mxu1 %vm668_vm1, %v667_v1 }
   0x8   :  { %70 = vperm.xlu0 %643, %v41_v7  }
   0x9   :  { %12 = vsyncpa [#allocation3], 0  ;;  %568 = vmatmul.mubr.msk.f32.gmra.mxu0 %vm78_vm2, %v30_v8  ;;  %v38_v10 = vld [vmem:[%s876_s2 + $0x10] sm:$0xff]  ;;  %60 = vperm.xlu1 %644, %v39_v9   ;;  %v37_v12 = vld [vmem:[%s876_s2 + $0x8] sm:$0xff]  ;;  %vm282_vm3 = vcmask 1041408   ;;  %vm260_vm4 = vcmask 408576  }
   0xa   :  { %570 = vmatprep.mubr.msk.f32.mxu0 %vm668_vm1, %v667_v1  ;;  %v31_v11 = vld [vmem:[%s875_s1 + $0x10] sm:$0xff]  ;;  %v36_v13 = vld [vmem:[%s876_s2] sm:$0xff]  ;;  %v32_v14 = vld [vmem:[%s875_s1 + $0x18] sm:$0xff]  ;;  %s670_s14 = smov [#allocation2]  }
   0xb   :  { %v224_v15 = vld [vmem:[%s878_s4 + $0x30] sm:$0x3]  ;;  %v223_v16 = vld [vmem:[%s878_s4 + $0x28] sm:$0xff]  ;;  %v33_v17 = vld [vmem:[%s875_s1 + $0x20] sm:$0xff]  ;;  %s498_s15 = sshll.u32 %s670_s14, 4  ;;  %s499_s15 = int_to_ptr.vmem [resolvable:$true] %s498_s15 }
   0xc   :  { %55 = vperm.xlu0 %643, %v38_v10   ;;  %v222_v18 = vld [vmem:[%s878_s4 + $0x20] sm:$0xff]  ;;  %v221_v19 = vld [vmem:[%s878_s4 + $0x18] sm:$0xff]  ;;  %v34_v20 = vld [vmem:[%s875_s1 + $0x28] sm:$0xff]  ;;  %s645_s16 = scalar_lea.vmem %s499_s15, 256  ;;  %p650_p1 = scmp.lt.s32.totalorder %s499_s15, %s499_s15 }
   0xd   :  { %571 = vmatmul.mubr.msk.f32.gmra.mxu0 %vm78_vm2, %v31_v11  ;;  %50 = vperm.xlu1 %644, %v37_v12   ;;  %v220_v21 = vld [vmem:[%s878_s4 + $0x10] sm:$0xff]  ;;  %v219_v22 = vld [vmem:[%s878_s4 + $0x8] sm:$0xff]  ;;  %v218_v24 = vld [vmem:[%s878_s4] sm:$0xff]  ;;  %p646_p0 = scmp.ne.s32.totalorder %s499_s15, %s645_s16  ;;  %p651_p2 = scmp.lt.s32.totalorder %s645_s16, %s645_s16 }
   0xe   :  { %573 = vmatprep.mubr.msk.f32.mxu0 %vm668_vm1, %v667_v1  ;;  %v35_v23 = vld [vmem:[%s875_s1 + $0x30] sm:$0x3]  ;;  %v395_v25 = vld [vmem:[%s880_s6] sm:$0xff]  ;;  %v396_v26 = vld [vmem:[%s880_s6 + $0x8] sm:$0x3f] }
   0xf   :  { %v211_v62 = vld [vmem:[%s877_s3] sm:$0xff]  ;;  %v212_v63 = vld [vmem:[%s877_s3 + $0x8] sm:$0xff]  ;;  %v213_v0 = vld [vmem:[%s877_s3 + $0x10] sm:$0xff]  ;;  %p652_p3 = por %p651_p2, %p650_p1 }
  0x10   :  { %45 = vperm.xlu0 %643, %v36_v13   ;;  %v214_v2 = vld [vmem:[%s877_s3 + $0x18] sm:$0xff]  ;;  %v215_v3 = vld [vmem:[%s877_s3 + $0x20] sm:$0xff]  ;;  %v216_v4 = vld [vmem:[%s877_s3 + $0x28] sm:$0xff] }
  0x11   :  { %574 = vmatmul.mubr.msk.f32.gmra.mxu0 %vm78_vm2, %v32_v14  ;;  %257 = vperm.xlu1 %644, %v224_v15   ;;  %v217_v5 = vld [vmem:[%s877_s3 + $0x30] sm:$0x3]  ;;  %v393_v6 = vld [vmem:[%s879_s5] sm:$0xff]  ;;  %p653_p4 = pnand %p652_p3, %p646_p0 }
  0x12   :  { %576 = vmatprep.mubr.msk.f32.mxu0 %vm668_vm1, %v667_v1 }
  0x14   :  { %252 = vperm.xlu0 %643, %v223_v16  }
  0x15   :  { %577 = vmatmul.mubr.msk.f32.gmra.mxu0 %vm78_vm2, %v33_v17  ;;  %247 = vperm.xlu1 %644, %v222_v18  }
  0x16   :  { %579 = vmatprep.mubr.msk.f32.mxu0 %vm668_vm1, %v667_v1 }
  0x18   :  { %242 = vperm.xlu0 %643, %v221_v19  }
  0x19   :  { %580 = vmatmul.mubr.msk.f32.gmra.mxu0 %vm78_vm2, %v34_v20  ;;  %237 = vperm.xlu1 %644, %v220_v21  }
  0x1a   :  { %582 = vmatprep.mubr.msk.f32.mxu0 %vm668_vm1, %v667_v1 }
  0x1c   :  { %232 = vperm.xlu0 %643, %v219_v22  }
  0x1d   :  { %583 = vmatmul.mubr.msk.f32.gmra.mxu0 %vm78_vm2, %v35_v23  ;;  %227 = vperm.xlu1 %644, %v218_v24  }
  0x1e   :  { %634 = vmatprep.mubr.msk.f32.mxu0 %vm260_vm4, %v393_v6 }
  0x20   :  { %399 = vperm.xlu0 %643, %v395_v25  }
  0x21   :  { %404 = vperm.xlu1 %644, %v396_v26  }
  0x7f   :  { %v76_v34 = vpop.permute.xlu0 %75 }
  0x80   :  { %v66_v37 = vpop.permute.xlu1 %65 }
  0x83   :  { %v71_v39 = vpop.permute.xlu0 %70 }
  0x84   :  { %v61_v42 = vpop.permute.xlu1 %60 }
  0x87   :  { %v56_v46 = vpop.permute.xlu0 %55 }
  0x88   :  { %v51_v52 = vpop.permute.xlu1 %50 }
  0x8b   :  { %v46_v55 = vpop.permute.xlu0 %45 }
  0x8c   :  { %v258_v14 = vpop.permute.xlu1 %257 }
  0x8f   :  { %v253_v17 = vpop.permute.xlu0 %252 }
  0x90   :  { %v248_v19 = vpop.permute.xlu1 %247 }
  0x93   :  { %v243_v24 = vpop.permute.xlu0 %242 }
  0xc5   :  { %v170_v27 = vpop.f32.mrf.mxu0 }
  0xc6   :  { %v171_v58 = vadd.f32 %v170_v27, %v46_v55 }
  0xc7   :  { %v566_v28 = vpop.f32.mrf.mxu0 }
  0xc8   :  { %v204_v61 = vmax.f32 %v171_v58, 0.0  ;;  %v238_v28 = vpop.permute.xlu1 %237 }
  0xc9   :  { %v175_v29 = vpop.f32.mrf.mxu0 }
  0xca   :  { %v176_v56 = vadd.f32 %v175_v29, %v51_v52 }
  0xcb   :  { %v569_v30 = vpop.f32.mrf.mxu0 }
  0xcc   :  { %v205_v60 = vmax.f32 %v176_v56, 0.0 }
  0xcd   :  { %v180_v31 = vpop.f32.mrf.mxu0 }
  0xce   :  { %v181_v53 = vadd.f32 %v180_v31, %v56_v46 }
  0xcf   :  { %v572_v32 = vpop.f32.mrf.mxu0 }
  0xd0   :  { %v206_v59 = vmax.f32 %v181_v53, 0.0 }
  0xd1   :  { %v185_v33 = vpop.f32.mrf.mxu0 }
  0xd2   :  { %v186_v50 = vadd.f32 %v185_v33, %v61_v42  ;;  %v233_v33 = vpop.permute.xlu0 %232 }
  0xd3   :  { %v575_v35 = vpop.f32.mrf.mxu0 }
  0xd4   :  { %v207_v57 = vmax.f32 %v186_v50, 0.0 }
  0xd5   :  { %v190_v36 = vpop.f32.mrf.mxu0 }
  0xd6   :  { %v191_v48 = vadd.f32 %v190_v36, %v66_v37  ;;  %v228_v36 = vpop.permute.xlu1 %227 }
  0xd7   :  { %v578_v38 = vpop.f32.mrf.mxu0 }
  0xd8   :  { %v208_v54 = vmax.f32 %v191_v48, 0.0 }
  0xd9   :  { %v195_v40 = vpop.f32.mrf.mxu0 }
  0xda   :  { %v196_v44 = vadd.f32 %v195_v40, %v71_v39  ;;  %v405_v42 = vpop.permute.xlu1 %404 }
  0xdb   :  { %v581_v41 = vpop.f32.mrf.mxu0 }
  0xdc   :  { %v209_v51 = vmax.f32 %v196_v44, 0.0  ;;  %v394_v41 = vld [vmem:[%s879_s5 + $0x8] sm:$0x3f] }
  0xdd   :  { %v200_v43 = vpop.f32.mrf.mxu0 }
  0xde   :  { %v201_v45 = vadd.f32 %v200_v43, %v76_v34 }
  0xdf   :  { %v584_v47 = vpop.f32.mrf.mxu0 }
  0xe0   :  { %v210_v49 = vmax.f32 %v201_v45, 0.0  ;;  %v400_v45 = vpop.permute.xlu0 %399 }
  0xe2   :  { %586 = vmatpush3.msk.msra.mxu1 %vm282_vm3, %v210_v49 }
  0xe3   :  { %587 = vmatprep.subr.mxu1 %v667_v1 }
  0xe4   :  { %588 = vmatpush3.msra.mxu1 %v209_v51 }
  0xe5   :  { %589 = vmatprep.subr.mxu1 %v667_v1 }
  0xe6   :  { %590 = vmatpush3.msra.mxu1 %v208_v54 }
  0xe7   :  { %591 = vmatprep.subr.mxu1 %v667_v1 }
  0xe8   :  { %592 = vmatpush3.msra.mxu1 %v207_v57 }
  0xe9   :  { %593 = vmatprep.subr.mxu1 %v667_v1 }
  0xea   :  { %594 = vmatpush3.msra.mxu1 %v206_v59 }
  0xeb   :  { %595 = vmatprep.subr.mxu1 %v667_v1 }
  0xec   :  { %596 = vmatpush3.msra.mxu1 %v205_v60 }
  0xed   :  { %597 = vmatprep.subr.mxu1 %v667_v1 }
  0xee   :  { %598 = vmatpush3.msra.mxu1 %v204_v61 }
  0xef   :  { %600 = vmatmul.mubr.msk.f32.vlgmr.msra.gmra.mxu1 %vm260_vm4, %v211_v62 }
  0xf0   :  { %602 = vmatprep.mubr.msk.f32.mxu1 %vm668_vm1, %v667_v1 }
  0xf3   :  { %603 = vmatmul.mubr.msk.f32.gmra.mxu1 %vm260_vm4, %v212_v63 }
  0xf4   :  { %605 = vmatprep.mubr.msk.f32.mxu1 %vm668_vm1, %v667_v1 }
  0xf7   :  { %606 = vmatmul.mubr.msk.f32.gmra.mxu1 %vm260_vm4, %v213_v0 }
  0xf8   :  { %608 = vmatprep.mubr.msk.f32.mxu1 %vm668_vm1, %v667_v1 }
  0xfb   :  { %609 = vmatmul.mubr.msk.f32.gmra.mxu1 %vm260_vm4, %v214_v2 }
  0xfc   :  { %611 = vmatprep.mubr.msk.f32.mxu1 %vm668_vm1, %v667_v1 }
  0xff   :  { %612 = vmatmul.mubr.msk.f32.gmra.mxu1 %vm260_vm4, %v215_v3 }
 0x100   :  { %614 = vmatprep.mubr.msk.f32.mxu1 %vm668_vm1, %v667_v1 }
 0x103   :  { %615 = vmatmul.mubr.msk.f32.gmra.mxu1 %vm260_vm4, %v216_v4 }
 0x104   :  { %617 = vmatprep.mubr.msk.f32.mxu1 %vm668_vm1, %v667_v1 }
 0x107   :  { %618 = vmatmul.mubr.msk.f32.gmra.mxu1 %vm260_vm4, %v217_v5 }
 0x1af   :  { %v352_v7 = vpop.f32.mrf.mxu1 }
 0x1b0   :  { %v353_v37 = vadd.f32 %v352_v7, %v228_v36 }
 0x1b1   :  { %v601_v8 = vpop.f32.mrf.mxu1 }
 0x1b2   :  { %v386_v40 = vmax.f32 %v353_v37, 0.0 }
 0x1b3   :  { %v357_v9 = vpop.f32.mrf.mxu1 }
 0x1b4   :  { %v358_v34 = vadd.f32 %v357_v9, %v233_v33 }
 0x1b5   :  { %v604_v10 = vpop.f32.mrf.mxu1 }
 0x1b6   :  { %v387_v39 = vmax.f32 %v358_v34, 0.0 }
 0x1b7   :  { %v362_v11 = vpop.f32.mrf.mxu1 }
 0x1b8   :  { %v363_v31 = vadd.f32 %v362_v11, %v238_v28 }
 0x1b9   :  { %v607_v12 = vpop.f32.mrf.mxu1 }
 0x1ba   :  { %v388_v38 = vmax.f32 %v363_v31, 0.0 }
 0x1bb   :  { %v367_v13 = vpop.f32.mrf.mxu1 }
 0x1bc   :  { %v368_v29 = vadd.f32 %v367_v13, %v243_v24 }
 0x1bd   :  { %v610_v1 = vpop.f32.mrf.mxu1 }
 0x1be   :  { %v389_v35 = vmax.f32 %v368_v29, 0.0 }
 0x1bf   :  { %v372_v15 = vpop.f32.mrf.mxu1 }
 0x1c0   :  { %v373_v26 = vadd.f32 %v372_v15, %v248_v19 }
 0x1c1   :  { %v613_v16 = vpop.f32.mrf.mxu1 }
 0x1c2   :  { %v390_v32 = vmax.f32 %v373_v26, 0.0 }
 0x1c3   :  { %v377_v18 = vpop.f32.mrf.mxu1 }
 0x1c4   :  { %v378_v22 = vadd.f32 %v377_v18, %v253_v17 }
 0x1c5   :  { %v616_v20 = vpop.f32.mrf.mxu1 }
 0x1c6   :  { %v391_v30 = vmax.f32 %v378_v22, 0.0 }
 0x1c7   :  { %v382_v21 = vpop.f32.mrf.mxu1 }
 0x1c8   :  { %v383_v23 = vadd.f32 %v382_v21, %v258_v14 }
 0x1c9   :  { %v619_v25 = vpop.f32.mrf.mxu1 }
 0x1ca   :  { %v392_v27 = vmax.f32 %v383_v23, 0.0 }
 0x1cc   :  { %620 = vmatprep.subr.msk.mxu0 %vm282_vm3, %v392_v27 }
 0x1cd   :  { %621 = vmatpush3.msk.msra.mxu0 %vm282_vm3, %v392_v27 }
 0x1ce   :  { %622 = vmatprep.subr.mxu0 %v391_v30 }
 0x1cf   :  { %623 = vmatpush3.msra.mxu0 %v391_v30 }
 0x1d0   :  { %624 = vmatprep.subr.mxu0 %v390_v32 }
 0x1d1   :  { %625 = vmatpush3.msra.mxu0 %v390_v32 }
 0x1d2   :  { %626 = vmatprep.subr.mxu0 %v389_v35 }
 0x1d3   :  { %627 = vmatpush3.msra.mxu0 %v389_v35 }
 0x1d4   :  { %628 = vmatprep.subr.mxu0 %v388_v38 }
 0x1d5   :  { %629 = vmatpush3.msra.mxu0 %v388_v38 }
 0x1d6   :  { %630 = vmatprep.subr.mxu0 %v387_v39 }
 0x1d7   :  { %631 = vmatpush3.msra.mxu0 %v387_v39 }
 0x1d8   :  { %632 = vmatprep.subr.mxu0 %v386_v40 }
 0x1d9   :  { %633 = vmatpush3.msra.mxu0 %v386_v40 }
 0x1da   :  { %635 = vmatmul.mubr.msk.f32.vlgmr.msra.gmra.mxu0 %vm260_vm4, %v394_v41 }
 0x29a   :  { %v636_v43 = vpop.f32.mrf.mxu0 }
 0x29b   :  { %v488_v44 = vadd.f32 %v636_v43, %v405_v42 }
 0x29c   :  { %v482_v46 = vpop.f32.mrf.mxu0 }
 0x29d   :  { %492 = vst [vmem:[#allocation2 + $0x8] sm:$0x3f] %v488_v44  ;;  %v483_v47 = vadd.f32 %v482_v46, %v400_v45 }
 0x29f   :  { %491 = vst [vmem:[#allocation2] sm:$0xff] %v483_v47 }
 0x2a0   :  { %656 = shalt.err (!%p653_p4)
}
 0x2a1   :  { %s671_s5 = smov 128   ;;  %s672_s17 = smov 8  }
 0x2a2   :  { %504 = dma.vmem_to_hbm [thread:$0]  %s499_s15, 256, %s881_s7, [#allocation3], %s671_s5, %s671_s5, %s672_s17  }
 0x2a3   :  { %665 = dma.done.wait [#allocation3], 256  }
 0x2a4   :  { %666 = vsyncadd [#allocation3], 4294967040 }
 0x2a5   :  { %508 = vsyncpa [#allocation3], 1 }

</bundles_post_ra>
